<compile_context>
chip_gen: v7x
topology: tpu7x:2x2x1
jax: 0.10.0
libtpu: 0.0.40
codegen_flags: <defaults>
</compile_context>

<pallas_src>
import jax
import jax.numpy as jnp
from jax.experimental import pallas as pl
from jax.experimental.pallas import tpu as pltpu

BATCH = 1          # kernel recurrence is written for batch_size == 1 (as in the spec)
SEQ = 6            # sequence_length
VOCAB = 5          # input_size (embedding vocab)
EMB = 10           # embedding_size
HIDDEN = 5         # hidden_size
NUM_CLASSES = 5

# Packed weight-slab layout: one f32 (24, 128) VMEM input. Sub-blocks start on 8-sublane
# boundaries so every static load stays inside a single (8, 128) tile.
SLAB_ROWS = 24
SLAB_LANES = 128
WCOMB_ROW = 0      # rows 0..4  : W_comb = emb_table @ W_ih^T + (b_ih + b_hh)   (VOCAB, HIDDEN)
WHH_ROW = 8        # rows 8..12 : W_hh^T                                        (HIDDEN, HIDDEN)
WFC_ROW = 16       # rows 16..20: W_fc^T                                        (HIDDEN, NUM_CLASSES)
BFC_ROW = 21       # row 21     : b_fc                                          (NUM_CLASSES,)


def rnn_emb_kernel(ids_ref, slab_ref, out_ref):
    # ids_ref : (SEQ,) int32 token ids in SMEM (cheap scalar reads).
    # slab_ref: (SLAB_ROWS, SLAB_LANES) f32 packed weights in VMEM.
    # out_ref : (SEQ, NUM_CLASSES) f32.

    # Hoisted recurrent weight load: W_hh^T stays resident in vregs across the unrolled loop.
    whh = slab_ref[WHH_ROW:WHH_ROW + HIDDEN, 0:HIDDEN]              # (HIDDEN, HIDDEN)

    # Gather the precombined per-step input term: pre_t = W_comb[token_t]
    # (= emb[token_t] @ W_ih^T + b_ih + b_hh, folded once in the wrapper).
    # These 6 dynamic sublane loads are independent and sit before the serial chain.
    pres = []
    for t in range(SEQ):
        tok = ids_ref[t]                                            # SMEM scalar read
        row = slab_ref[pl.ds(tok, 1), :]                            # (1, SLAB_LANES)
        pres.append(row[:, 0:HIDDEN])                               # (1, HIDDEN)

    # Sequential Elman RNN recurrence (h_0 = 0), statically unrolled (SEQ = 6).
    # Per-step work on the serial chain: one tiny MXU dot + VPU add + EUP tanh.
    # (Relying on Mosaic to keep the (5,5) RHS staged; explicit matmul_push_rhs not needed
    #  at this size.)
    h = jnp.zeros((1, HIDDEN), jnp.float32)
    hs = []
    for t in range(SEQ):
        h = jnp.tanh(pres[t] + jnp.dot(h, whh, preferred_element_type=jnp.float32))
        hs.append(h)
    h_all = jnp.concatenate(hs, axis=0)                             # (SEQ, HIDDEN)

    # Final Linear applied once to all timesteps, single full-block store.
    wfc = slab_ref[WFC_ROW:WFC_ROW + HIDDEN, 0:NUM_CLASSES]         # (HIDDEN, NUM_CLASSES)
    bfc = slab_ref[BFC_ROW:BFC_ROW + 1, 0:NUM_CLASSES]              # (1, NUM_CLASSES)
    out_ref[...] = (jnp.dot(h_all, wfc, preferred_element_type=jnp.float32) + bfc)


def prepare_params(params):
    """One-time parameter prep (fold + transpose + pack). Do NOT call per forward pass."""
    emb_table, w_ih, w_hh, b_ih, b_hh, w_fc, b_fc = params
    # Fold embedding lookup, input projection, and both RNN biases into one 5x5 table.
    # Bit-exact for the bias fold (each token selects exactly one row).
    w_comb = emb_table @ w_ih.T + (b_ih + b_hh)[None, :]            # (VOCAB, HIDDEN)

    slab = jnp.zeros((SLAB_ROWS, SLAB_LANES), jnp.float32)
    slab = slab.at[WCOMB_ROW:WCOMB_ROW + VOCAB, 0:HIDDEN].set(w_comb)
    slab = slab.at[WHH_ROW:WHH_ROW + HIDDEN, 0:HIDDEN].set(w_hh.T)
    slab = slab.at[WFC_ROW:WFC_ROW + HIDDEN, 0:NUM_CLASSES].set(w_fc.T)
    slab = slab.at[BFC_ROW, 0:NUM_CLASSES].set(b_fc)
    return slab


@jax.jit
def model_forward(x, slab):
    """x: (BATCH, SEQ) int32 token ids. slab: prepare_params(...) output.

    Returns (BATCH*SEQ, NUM_CLASSES) float32, matching fc(out.view(-1, 5))."""
    ids = x.reshape(BATCH * SEQ).astype(jnp.int32)
    return pl.pallas_call(
        rnn_emb_kernel,
        out_shape=jax.ShapeDtypeStruct((BATCH * SEQ, NUM_CLASSES), jnp.float32),
        in_specs=[
            pl.BlockSpec(memory_space=pltpu.MemorySpace.SMEM),   # token ids -> SMEM scalars
            pl.BlockSpec(memory_space=pltpu.MemorySpace.VMEM),   # packed weight slab
        ],
        out_specs=pl.BlockSpec(memory_space=pltpu.MemorySpace.VMEM),
    )(ids, slab)


def init_params(key):
    """Deterministic synthetic parameters matching the PyTorch module shapes."""
    ks = jax.random.split(key, 7)
    emb_table = jax.random.normal(ks[0], (VOCAB, EMB), jnp.float32)          # nn.Embedding
    bound = 1.0 / jnp.sqrt(HIDDEN)
    w_ih = jax.random.uniform(ks[1], (HIDDEN, EMB), jnp.float32, -bound, bound)     # weight_ih_l0
    w_hh = jax.random.uniform(ks[2], (HIDDEN, HIDDEN), jnp.float32, -bound, bound)  # weight_hh_l0
    b_ih = jax.random.uniform(ks[3], (HIDDEN,), jnp.float32, -bound, bound)
    b_hh = jax.random.uniform(ks[4], (HIDDEN,), jnp.float32, -bound, bound)
    w_fc = jax.random.uniform(ks[5], (NUM_CLASSES, HIDDEN), jnp.float32, -bound, bound)  # nn.Linear
    b_fc = jax.random.uniform(ks[6], (NUM_CLASSES,), jnp.float32, -bound, bound)
    return (emb_table, w_ih, w_hh, b_ih, b_hh, w_fc, b_fc)


if __name__ == "__main__":
    key = jax.random.PRNGKey(0)
    pkey, xkey = jax.random.split(key)
    params = init_params(pkey)
    slab = prepare_params(params)          # one-time fold/transpose/pack

    # Example input: (batch=1, seq=6) token ids in [0, VOCAB)
    x = jax.random.randint(xkey, (BATCH, SEQ), 0, VOCAB, dtype=jnp.int32)

    out = model_forward(x, slab)
    out = jax.block_until_ready(out)
    assert out.shape == (BATCH * SEQ, NUM_CLASSES), out.shape
    assert out.dtype == jnp.float32

    # Pure-JAX reference of the original (unfolded) math.
    emb_table, w_ih, w_hh, b_ih, b_hh, w_fc, b_fc = params
    emb = emb_table[x.reshape(-1)]                                  # (SEQ, EMB)
    h = jnp.zeros((1, HIDDEN), jnp.float32)
    ref_rows = []
    for t in range(SEQ):
        h = jnp.tanh(emb[t:t + 1] @ w_ih.T + b_ih + h @ w_hh.T + b_hh)
        ref_rows.append(h @ w_fc.T + b_fc)
    ref = jnp.concatenate(ref_rows, axis=0)
    assert jnp.allclose(out, ref, atol=1e-5, rtol=1e-5), (out, ref)

    print("KERNEL_OK")
</pallas_src>

<mosaic_0001>
module attributes {stable_mosaic.version = 11 : i64} {
  func.func @rnn_emb_kernel(%arg0: memref<6xi32, #tpu.memory_space<smem>>, %arg1: memref<24x128xf32, #tpu.memory_space<vmem>>, %arg2: memref<6x5xf32, #tpu.memory_space<vmem>>) attributes {dimension_semantics = [], scalar_prefetch = 0 : i64, scratch_operands = 0 : i64, tpu.core_type = #tpu.core_type<tc>} {
    %c8 = arith.constant 8 : index
    %c0 = arith.constant 0 : index
    %0 = vector.load %arg1[%c8, %c0] : memref<24x128xf32, #tpu.memory_space<vmem>>, vector<5x5xf32>
    %c0_0 = arith.constant 0 : index
    %1 = memref.load %arg0[%c0_0] : memref<6xi32, #tpu.memory_space<smem>>
    %2 = arith.index_cast %1 : i32 to index
    %c0_1 = arith.constant 0 : index
    %3 = vector.load %arg1[%2, %c0_1] : memref<24x128xf32, #tpu.memory_space<vmem>>, vector<1x128xf32>
    %4 = vector.extract_strided_slice %3 {offsets = [0, 0], sizes = [1, 5], strides = [1, 1]} : vector<1x128xf32> to vector<1x5xf32>
    %c1 = arith.constant 1 : index
    %5 = memref.load %arg0[%c1] : memref<6xi32, #tpu.memory_space<smem>>
    %6 = arith.index_cast %5 : i32 to index
    %c0_2 = arith.constant 0 : index
    %7 = vector.load %arg1[%6, %c0_2] : memref<24x128xf32, #tpu.memory_space<vmem>>, vector<1x128xf32>
    %8 = vector.extract_strided_slice %7 {offsets = [0, 0], sizes = [1, 5], strides = [1, 1]} : vector<1x128xf32> to vector<1x5xf32>
    %c2 = arith.constant 2 : index
    %9 = memref.load %arg0[%c2] : memref<6xi32, #tpu.memory_space<smem>>
    %10 = arith.index_cast %9 : i32 to index
    %c0_3 = arith.constant 0 : index
    %11 = vector.load %arg1[%10, %c0_3] : memref<24x128xf32, #tpu.memory_space<vmem>>, vector<1x128xf32>
    %12 = vector.extract_strided_slice %11 {offsets = [0, 0], sizes = [1, 5], strides = [1, 1]} : vector<1x128xf32> to vector<1x5xf32>
    %c3 = arith.constant 3 : index
    %13 = memref.load %arg0[%c3] : memref<6xi32, #tpu.memory_space<smem>>
    %14 = arith.index_cast %13 : i32 to index
    %c0_4 = arith.constant 0 : index
    %15 = vector.load %arg1[%14, %c0_4] : memref<24x128xf32, #tpu.memory_space<vmem>>, vector<1x128xf32>
    %16 = vector.extract_strided_slice %15 {offsets = [0, 0], sizes = [1, 5], strides = [1, 1]} : vector<1x128xf32> to vector<1x5xf32>
    %c4 = arith.constant 4 : index
    %17 = memref.load %arg0[%c4] : memref<6xi32, #tpu.memory_space<smem>>
    %18 = arith.index_cast %17 : i32 to index
    %c0_5 = arith.constant 0 : index
    %19 = vector.load %arg1[%18, %c0_5] : memref<24x128xf32, #tpu.memory_space<vmem>>, vector<1x128xf32>
    %20 = vector.extract_strided_slice %19 {offsets = [0, 0], sizes = [1, 5], strides = [1, 1]} : vector<1x128xf32> to vector<1x5xf32>
    %c5 = arith.constant 5 : index
    %21 = memref.load %arg0[%c5] : memref<6xi32, #tpu.memory_space<smem>>
    %22 = arith.index_cast %21 : i32 to index
    %c0_6 = arith.constant 0 : index
    %23 = vector.load %arg1[%22, %c0_6] : memref<24x128xf32, #tpu.memory_space<vmem>>, vector<1x128xf32>
    %24 = vector.extract_strided_slice %23 {offsets = [0, 0], sizes = [1, 5], strides = [1, 1]} : vector<1x128xf32> to vector<1x5xf32>
    %cst = arith.constant 0.000000e+00 : f32
    %25 = vector.broadcast %cst : f32 to vector<1x5xf32>
    %cst_7 = arith.constant dense<0.000000e+00> : vector<1x5xf32>
    %26 = tpu.matmul %25, %0, %cst_7 {dimension_numbers = #tpu.dot_dimension_numbers<[1], [0], [0], [1], [0, 0, 1, 1], [], []>} : vector<1x5xf32>, vector<5x5xf32>, vector<1x5xf32> -> vector<1x5xf32>
    %27 = arith.addf %4, %26 : vector<1x5xf32>
    %28 = math.tanh %27 : vector<1x5xf32>
    %cst_8 = arith.constant dense<0.000000e+00> : vector<1x5xf32>
    %29 = tpu.matmul %28, %0, %cst_8 {dimension_numbers = #tpu.dot_dimension_numbers<[1], [0], [0], [1], [0, 0, 1, 1], [], []>} : vector<1x5xf32>, vector<5x5xf32>, vector<1x5xf32> -> vector<1x5xf32>
    %30 = arith.addf %8, %29 : vector<1x5xf32>
    %31 = math.tanh %30 : vector<1x5xf32>
    %cst_9 = arith.constant dense<0.000000e+00> : vector<1x5xf32>
    %32 = tpu.matmul %31, %0, %cst_9 {dimension_numbers = #tpu.dot_dimension_numbers<[1], [0], [0], [1], [0, 0, 1, 1], [], []>} : vector<1x5xf32>, vector<5x5xf32>, vector<1x5xf32> -> vector<1x5xf32>
    %33 = arith.addf %12, %32 : vector<1x5xf32>
    %34 = math.tanh %33 : vector<1x5xf32>
    %cst_10 = arith.constant dense<0.000000e+00> : vector<1x5xf32>
    %35 = tpu.matmul %34, %0, %cst_10 {dimension_numbers = #tpu.dot_dimension_numbers<[1], [0], [0], [1], [0, 0, 1, 1], [], []>} : vector<1x5xf32>, vector<5x5xf32>, vector<1x5xf32> -> vector<1x5xf32>
    %36 = arith.addf %16, %35 : vector<1x5xf32>
    %37 = math.tanh %36 : vector<1x5xf32>
    %cst_11 = arith.constant dense<0.000000e+00> : vector<1x5xf32>
    %38 = tpu.matmul %37, %0, %cst_11 {dimension_numbers = #tpu.dot_dimension_numbers<[1], [0], [0], [1], [0, 0, 1, 1], [], []>} : vector<1x5xf32>, vector<5x5xf32>, vector<1x5xf32> -> vector<1x5xf32>
    %39 = arith.addf %20, %38 : vector<1x5xf32>
    %40 = math.tanh %39 : vector<1x5xf32>
    %cst_12 = arith.constant dense<0.000000e+00> : vector<1x5xf32>
    %41 = tpu.matmul %40, %0, %cst_12 {dimension_numbers = #tpu.dot_dimension_numbers<[1], [0], [0], [1], [0, 0, 1, 1], [], []>} : vector<1x5xf32>, vector<5x5xf32>, vector<1x5xf32> -> vector<1x5xf32>
    %42 = arith.addf %24, %41 : vector<1x5xf32>
    %43 = math.tanh %42 : vector<1x5xf32>
    %44 = tpu.concatenate %28, %31, %34, %37, %40, %43 in 0 : vector<1x5xf32>, vector<1x5xf32>, vector<1x5xf32>, vector<1x5xf32>, vector<1x5xf32>, vector<1x5xf32> -> vector<6x5xf32>
    %c16 = arith.constant 16 : index
    %c0_13 = arith.constant 0 : index
    %45 = vector.load %arg1[%c16, %c0_13] : memref<24x128xf32, #tpu.memory_space<vmem>>, vector<5x5xf32>
    %c21 = arith.constant 21 : index
    %c0_14 = arith.constant 0 : index
    %46 = vector.load %arg1[%c21, %c0_14] : memref<24x128xf32, #tpu.memory_space<vmem>>, vector<1x5xf32>
    %cst_15 = arith.constant dense<0.000000e+00> : vector<6x5xf32>
    %47 = tpu.matmul %44, %45, %cst_15 {dimension_numbers = #tpu.dot_dimension_numbers<[1], [0], [0], [1], [0, 0, 1, 1], [], []>} : vector<6x5xf32>, vector<5x5xf32>, vector<6x5xf32> -> vector<6x5xf32>
    %48 = vector.broadcast %46 : vector<1x5xf32> to vector<6x5xf32>
    %49 = arith.addf %47, %48 : vector<6x5xf32>
    %c0_16 = arith.constant 0 : index
    %c0_17 = arith.constant 0 : index
    %50 = vector.load %arg2[%c0_16, %c0_17] : memref<6x5xf32, #tpu.memory_space<vmem>>, vector<6x5xf32>
    tpu.vector_store %arg2[%c0_16, %c0_17], %49 {strides = array<i32>} : memref<6x5xf32, #tpu.memory_space<vmem>>, vector<6x5xf32>,
    return
  }
}

</mosaic_0001>

<bundles_post_ra>
// kernel: model_forward.1
= control target key start
LH: loop header
LB: loop body
LE: loop exit
PB: predicated region body
PF: predicated region fallthrough
CT: control target
= control target key end

     0   :  { %7 = vsyncpa [#allocation5], 0  ;;  %s873_s0 = inlined_call_operand.vmem [shape: s32[6], index: 0, kind: input, shape index: {}]   ;;  %s874_s1 = inlined_call_operand.hbm [shape: f32[24,128], index: 1, kind: input, shape index: {}]   ;;  %s875_s2 = inlined_call_operand.hbm [shape: f32[6,5], index: 2, kind: output, shape index: {}]  }
   0x1   :  { %8 = vsyncpa [#allocation3], 0 }
   0x2   :  { %9 = vsyncpa [#allocation4], 0  ;;  %s16_s11 = sshll.u32 %s873_s0, 4  ;;  %s17_s11 = int_to_ptr.vmem [resolvable:$true] %s16_s11 }
   0x3   :  { %s726_s12 = scalar_lea.vmem %s17_s11, 16  ;;  %p731_p1 = scmp.lt.s32.totalorder %s17_s11, %s17_s11 }
   0x4   :  { %p727_p0 = scmp.ne.s32.totalorder %s17_s11, %s726_s12  ;;  %p732_p2 = scmp.lt.s32.totalorder %s726_s12, %s726_s12 }
   0x6   :  { %p733_p3 = por %p732_p2, %p731_p1 }
   0x8   :  { %p734_p4 = pnand %p733_p3, %p727_p0 }
   0xa   :  { %737 = shalt.err (!%p734_p4)
}
   0xb   :  { %s788_s13 = smov [#allocation2]   ;;  %s789_s14 = smov [#allocation6]  }
   0xc   :  { %19 = dma.vmem_to_smem %s17_s11, 16, %s788_s13, [#allocation5]  }
   0xd   :  { %s25_s15 = sshll.u32 %s789_s14, 4  ;;  %s738_s18 = scalar_lea.hbm %s874_s1, 384  ;;  %s26_s15 = int_to_ptr.vmem [resolvable:$true] %s25_s15 }
   0xe   :  { %p739_p5 = scmp.ne.s32.totalorder %s874_s1, %s738_s18  ;;  %p742_p6 = scmp.lt.u32.totalorder %s738_s18, %s874_s1 }
  0x10   :  { %p744_p7 = pnand %p742_p6, %p739_p5 }
  0x12   :  { %747 = shalt.err (!%p744_p7)
}
  0x13   :  { %s748_s22 = scalar_lea.vmem %s26_s15, 384  ;;  %p753_p9 = scmp.lt.s32.totalorder %s26_s15, %s26_s15 }
  0x14   :  { %p749_p8 = scmp.ne.s32.totalorder %s26_s15, %s748_s22  ;;  %p754_p10 = scmp.lt.s32.totalorder %s748_s22, %s748_s22 }
  0x16   :  { %p755_p11 = por %p754_p10, %p753_p9 }
  0x18   :  { %p756_p12 = pnand %p755_p11, %p749_p8 }
  0x1a   :  { %759 = shalt.err (!%p756_p12)
}
  0x1b   :  { %s790_s23 = smov 128   ;;  %s791_s24 = smov 8  }
  0x1c   :  { %31 = dma.hbm_to_vmem [thread:$0]  %s874_s1, 384, %s26_s15, [#allocation3], %s790_s23, %s790_s23, %s791_s24  }
  0x1d   :  { %782 = dma.done.wait [#allocation5], 16  }
  0x1e   :  { %783 = vsyncadd [#allocation5], 4294967280 }
  0x1f   :  { %784 = dma.done.wait [#allocation3], 384  }
  0x20   :  { %785 = vsyncadd [#allocation3], 4294966912 }
  0x21   :  { %38 = sfence }
  0x22   :  { %v39_v0 = vld [vmem:[#allocation6 + $0x8] sm:$0x1f]  ;;  %vm62_vm0 = vcmask 1044480   ;;  %v792_v1 = vmov 0.0   ;;  %vm793_vm1 = vmmov 0   ;;  %s40_s1 = sld [smem:[#allocation2]] }
  0x23   :  { %672 = vmatprep.subr.mxu0 %v792_v1  ;;  %674 = vmatprep.mubr.msk.f32.mxu0 %vm793_vm1, %v792_v1  ;;  %vm58_vm2 = vcmask 39936   ;;  %s639_s28 = sld [smem:[#allocation2 + $0x1]]  ;;  %s640_s30 = sld [smem:[#allocation2 + $0x2]]  ;;  %vm524_vm3 = vcmask 1040384   ;;  %vm526_vm4 = vcmask 1041408   ;;  %vm528_vm5 = vcmask 1042432  }
  0x24   :  { %673 = vmatpush3.msk.msra.mxu0 %vm62_vm0, %v39_v0  ;;  %677 = vmatprep.subr.mxu1 %v792_v1  ;;  %s641_s4 = sld [smem:[#allocation2 + $0x3]]  ;;  %s642_s6 = sld [smem:[#allocation2 + $0x4]]  ;;  %vm530_vm6 = vcmask 1043456   ;;  %v533_v35 = vld [vmem:[#allocation6 + $0x10] sm:$0x1f]  ;;  %vm615_vm7 = vcmask 37888  }
  0x25   :  { %675 = vmatmul.mubr.f32.vlgmr.msra.gmra.mrb[0].mxu0 %v792_v1  ;;  %678 = vmatpush3.msk.msra.mxu1 %vm62_vm0, %v39_v0  ;;  %s643_s8 = sld [smem:[#allocation2 + $0x5]]  ;;  %v655_v43 = vld [vmem:[#allocation6 + $0x15] ss:$0 sm:$0xff]  ;;  %s794_s10 = smov [#allocation7]  }
  0x26   :  { %679 = vmatprep.mubr.msk.f32.mxu1 %vm793_vm1, %v792_v1  ;;  %682 = vmatprep.subr.mxu0 %v792_v1  ;;  %s623_s11 = sshll.u32 %s794_s10, 4  ;;  %s624_s11 = int_to_ptr.vmem [resolvable:$true] %s623_s11 }
  0x27   :  { %683 = vmatpush3.msk.msra.mxu0 %vm62_vm0, %v39_v0  ;;  %684 = vmatprep.mubr.msk.f32.mxu0 %vm793_vm1, %v792_v1  ;;  %s760_s12 = scalar_lea.vmem %s624_s11, 128  ;;  %p765_p0 = scmp.lt.s32.totalorder %s624_s11, %s624_s11 }
  0x28   :  { %687 = vmatprep.subr.mxu1 %v792_v1  ;;  %692 = vmatprep.subr.mxu0 %v792_v1  ;;  %s41_s27 = scalar_lea.vmem [#allocation6], %s40_s1  ;;  %p761_p13 = scmp.ne.s32.totalorder %s624_s11, %s760_s12 }
  0x29   :  { %v42_v2 = vld [vmem:[%s41_s27] sm:$0x1]  ;;  %s44_s29 = scalar_lea.vmem [#allocation6], %s639_s28  ;;  %s47_s3 = scalar_lea.vmem [#allocation6], %s640_s30 }
  0x2a   :  { %v45_v7 = vld [vmem:[%s44_s29] sm:$0x1]  ;;  %s50_s5 = scalar_lea.vmem [#allocation6], %s641_s4  ;;  %s53_s7 = scalar_lea.vmem [#allocation6], %s642_s6 }
  0x2b   :  { %v48_v12 = vld [vmem:[%s47_s3] sm:$0x1]  ;;  %s56_s9 = scalar_lea.vmem [#allocation6], %s643_s8  ;;  %p766_p1 = scmp.lt.s32.totalorder %s760_s12, %s760_s12 }
  0x2c   :  { %v51_v21 = vld [vmem:[%s50_s5] sm:$0x1] }
  0x2d   :  { %v54_v28 = vld [vmem:[%s53_s7] sm:$0x1]  ;;  %p767_p2 = por %p766_p1, %p765_p0 }
  0x2e   :  { %v57_v36 = vld [vmem:[%s56_s9] sm:$0x1] }
  0x2f   :  { %p768_p3 = pnand %p767_p2, %p761_p13 }
  0xf8   :  { %v132_v3 = vpop.f32.mrb[0].mxu0 }
  0xf9   :  { %v136_v4 = vadd.f32 %v132_v3, %v42_v2  ;;  %v676_v5 = vpop.f32.mrb[1].mxu0 }
  0xfb   :  { %714 = vtanh.f32 %v136_v4 }
 0x105   :  { %v715_v6 = vpop.eup %714 }
 0x106   :  { %680 = vmatmul.mubr.msk.f32.vlgmr.msra.gmra.mrb[0].mxu1 %vm58_vm2, %v715_v6 }
 0x107   :  { %688 = vmatpush3.msk.msra.mxu1 %vm62_vm0, %v39_v0  ;;  %689 = vmatprep.mubr.msk.f32.mxu1 %vm793_vm1, %v792_v1 }
 0x108   :  { %697 = vmatprep.subr.mxu1 %v792_v1 }
 0x1d9   :  { %v207_v8 = vpop.f32.mrb[0].mxu1 }
 0x1da   :  { %v211_v9 = vadd.f32 %v207_v8, %v45_v7  ;;  %v681_v10 = vpop.f32.mrb[1].mxu1 }
 0x1dc   :  { %716 = vtanh.f32 %v211_v9 }
 0x1e6   :  { %v717_v11 = vpop.eup %716 }
 0x1e7   :  { %685 = vmatmul.mubr.msk.f32.vlgmr.msra.gmra.mrb[2].mxu0 %vm58_vm2, %v717_v11  ;;  %v513_v16 = vrot.slane %v717_v11, 7 }
 0x1e8   :  { %693 = vmatpush3.msk.msra.mxu0 %vm62_vm0, %v39_v0  ;;  %694 = vmatprep.mubr.msk.f32.mxu0 %vm793_vm1, %v792_v1 }
 0x1e9   :  { %702 = vmatprep.subr.mxu0 %v792_v1  ;;  %v525_v19 = vsel %vm524_vm3, %v715_v6, %v513_v16 }
 0x2ba   :  { %v282_v13 = vpop.f32.mrb[2].mxu0 }
 0x2bb   :  { %v286_v14 = vadd.f32 %v282_v13, %v48_v12  ;;  %v686_v15 = vpop.f32.mrb[3].mxu0 }
 0x2bd   :  { %718 = vtanh.f32 %v286_v14 }
 0x2c7   :  { %v719_v17 = vpop.eup %718 }
 0x2c8   :  { %v515_v18 = vrot.slane %v719_v17, 6  ;;  %690 = vmatmul.mubr.msk.f32.vlgmr.msra.gmra.mrb[2].mxu1 %vm58_vm2, %v719_v17 }
 0x2c9   :  { %698 = vmatpush3.msk.msra.mxu1 %vm62_vm0, %v39_v0  ;;  %699 = vmatprep.mubr.msk.f32.mxu1 %vm793_vm1, %v792_v1 }
 0x2ca   :  { %v527_v20 = vsel %vm526_vm4, %v525_v19, %v515_v18 }
 0x39b   :  { %v357_v22 = vpop.f32.mrb[2].mxu1 }
 0x39c   :  { %v361_v23 = vadd.f32 %v357_v22, %v51_v21  ;;  %v691_v24 = vpop.f32.mrb[3].mxu1 }
 0x39e   :  { %720 = vtanh.f32 %v361_v23 }
 0x3a8   :  { %v721_v25 = vpop.eup %720 }
 0x3a9   :  { %v517_v26 = vrot.slane %v721_v25, 5  ;;  %695 = vmatmul.mubr.msk.f32.vlgmr.msra.gmra.mrb[4].mxu0 %vm58_vm2, %v721_v25 }
 0x3aa   :  { %704 = vmatprep.mubr.msk.f32.mxu0 %vm793_vm1, %v792_v1  ;;  %703 = vmatpush3.msk.msra.mxu0 %vm62_vm0, %v533_v35 }
 0x3ab   :  { %v529_v27 = vsel %vm528_vm5, %v527_v20, %v517_v26 }
 0x47c   :  { %v432_v29 = vpop.f32.mrb[4].mxu0 }
 0x47d   :  { %v436_v30 = vadd.f32 %v432_v29, %v54_v28  ;;  %v696_v31 = vpop.f32.mrb[5].mxu0 }
 0x47f   :  { %722 = vtanh.f32 %v436_v30 }
 0x489   :  { %v723_v32 = vpop.eup %722 }
 0x48a   :  { %v519_v33 = vrot.slane %v723_v32, 4  ;;  %700 = vmatmul.mubr.msk.f32.vlgmr.msra.gmra.mrb[4].mxu1 %vm58_vm2, %v723_v32 }
 0x48c   :  { %v531_v34 = vsel %vm530_vm6, %v529_v27, %v519_v33 }
 0x55d   :  { %v507_v37 = vpop.f32.mrb[4].mxu1 }
 0x55e   :  { %v511_v38 = vadd.f32 %v507_v37, %v57_v36  ;;  %v701_v39 = vpop.f32.mrb[5].mxu1 }
 0x560   :  { %724 = vtanh.f32 %v511_v38 }
 0x56a   :  { %v725_v40 = vpop.eup %724 }
 0x56b   :  { %v522_v41 = vrot.slane %v725_v40, 3 }
 0x56d   :  { %v532_v42 = vsel %vm62_vm0, %v531_v34, %v522_v41 }
 0x56e   :  { %705 = vmatmul.mubr.msk.f32.vlgmr.msra.gmra.mrb[6].mxu0 %vm58_vm2, %v532_v42 }
 0x641   :  { %v611_v44 = vpop.f32.mrb[6].mxu0 }
 0x642   :  { %v612_v45 = vadd.f32 %v655_v43, %v611_v44  ;;  %v706_v46 = vpop.f32.mrb[7].mxu0 }
 0x644   :  { %616 = vst.msk [vmem:[#allocation7] sm:$0x3f] %vm615_vm7, %v612_v45 }
 0x645   :  { %771 = shalt.err (!%p768_p3)
}
 0x646   :  { %s772_s15 = scalar_lea.hbm %s875_s2, 128 }
 0x647   :  { %p773_p4 = scmp.ne.s32.totalorder %s875_s2, %s772_s15  ;;  %p776_p5 = scmp.lt.u32.totalorder %s772_s15, %s875_s2 }
 0x649   :  { %p778_p6 = pnand %p776_p5, %p773_p4 }
 0x64b   :  { %781 = shalt.err (!%p778_p6)
}
 0x64c   :  { %626 = dma.vmem_to_hbm [thread:$0]  %s624_s11, 128, %s875_s2, [#allocation4]  }
 0x64d   :  { %786 = dma.done.wait [#allocation4], 128  }
 0x64e   :  { %787 = vsyncadd [#allocation4], 4294967168 }
 0x64f   :  { %630 = vsyncpa [#allocation3], 1 }
 0x650   :  { %631 = vsyncpa [#allocation4], 1 }
 0x651   :  { %632 = vsyncpa [#allocation5], 1 }

</bundles_post_ra>
